<compile_context>
chip_gen: v7x
topology: tpu7x:2x2x1
jax: 0.10.0
libtpu: 0.0.40
codegen_flags: <defaults>
</compile_context>

<pallas_src>
import functools

import jax
import jax.numpy as jnp
from jax import lax
from jax.experimental import pallas as pl
from jax.experimental.pallas import tpu as pltpu


def _round_up(n, m):
    return ((n + m - 1) // m) * m


def _count_embed_kernel(x_ref, emb_ref, out_ref, acc_ref, *, inv_len):
    # x_ref:   (L, TB, 1) int32  -- indices, transposed so batch sits on sublanes
    # emb_ref: (TV, D)    f32    -- one vocab tile of the zero-padded embedding table
    # out_ref: (TB, D)    f32    -- dense output block (written once, at finalize)
    # acc_ref: (TB, D)    f32    -- accumulator, resident across the vocab grid axis
    k = pl.program_id(1)

    @pl.when(k == 0)
    def _init():
        acc_ref[...] = jnp.zeros_like(acc_ref)

    L, TB, _ = x_ref.shape
    TV = emb_ref.shape[0]
    base = k * TV

    # counts[b, v] = #{ l : x[b, l] == base + v }, built vectorized (VPU only).
    local = x_ref[...] - base                                   # (L, TB, 1) int32
    ids = lax.broadcasted_iota(jnp.int32, (L, TB, TV), 2)       # (L, TB, TV)
    onehot = (local == ids).astype(jnp.float32)                 # lane-broadcast compare
    counts = jnp.sum(onehot, axis=0)                            # (TB, TV) f32, exact ints

    # One MXU matmul per vocab tile, accumulated in f32.
    acc_ref[...] += jnp.dot(counts, emb_ref[...],
                            preferred_element_type=jnp.float32)

    @pl.when(k == pl.num_programs(1) - 1)
    def _finalize():
        out_ref[...] = (acc_ref[...] * jnp.float32(inv_len)).astype(out_ref.dtype)


def count_morgan_embedding(x, emb_table, *, batch_tile=128, vocab_tile=128):
    """x: (B, L) int indices in [0, vocab); emb_table: (vocab, D) float. -> (B, D)."""
    B, L = x.shape
    V, D = emb_table.shape

    # Tile / padding choices: 128-aligned vocab (K) and embed (N) dims for full MXU
    # tiles; batch tile is 8-aligned (sublane) and capped at 128.
    TB = min(batch_tile, _round_up(B, 8))
    B_pad = _round_up(B, TB)
    TV = vocab_tile
    V_pad = _round_up(V, TV)
    D_pad = _round_up(D, 128)

    # (L, B_pad, 1): batch on the sublane axis of each leading-L slice, trailing unit
    # lane dim so the in-kernel lane-broadcast against the vocab iota needs no reshape.
    x_t = jnp.transpose(x.astype(jnp.int32))[:, :, None]
    x_t = jnp.pad(x_t, ((0, 0), (0, B_pad - B), (0, 0)))

    # Zero-fill padded vocab rows / embed cols so they contribute nothing.
    emb_p = jnp.pad(emb_table.astype(jnp.float32),
                    ((0, V_pad - V), (0, D_pad - D)))

    grid = (B_pad // TB, V_pad // TV)

    out = pl.pallas_call(
        functools.partial(_count_embed_kernel, inv_len=1.0 / L),
        out_shape=jax.ShapeDtypeStruct((B_pad, D_pad), jnp.float32),
        grid_spec=pltpu.PrefetchScalarGridSpec(
            num_scalar_prefetch=0,
            grid=grid,
            in_specs=[
                pl.BlockSpec((L, TB, 1), lambda i, k: (0, i, 0)),   # indices (VMEM)
                pl.BlockSpec((TV, D_pad), lambda i, k: (k, 0)),     # table vocab tile
            ],
            out_specs=pl.BlockSpec((TB, D_pad), lambda i, k: (i, 0)),
            scratch_shapes=[pltpu.VMEM((TB, D_pad), jnp.float32)],
        ),
        compiler_params=pltpu.CompilerParams(
            dimension_semantics=("parallel", "arbitrary")),
    )(x_t, emb_p)

    return out[:B, :D].astype(emb_table.dtype)


def make_params(embed_dim, bit_size, radius_size, key):
    vocab = bit_size * radius_size + 1
    emb = jax.random.normal(key, (vocab, embed_dim), dtype=jnp.float32)
    # padding_idx=0 -> row 0 is zero, exactly like nn.Embedding(padding_idx=0)
    emb = emb.at[0, :].set(0.0)
    return emb


if __name__ == "__main__":
    # Small, deterministic problem consistent with the module's forward:
    # seq_len == bit_size * radius_size, vocab == seq_len + 1.
    embed_dim = 128
    bit_size = 16
    radius_size = 4
    batch = 2
    seq_len = bit_size * radius_size        # 64
    vocab = seq_len + 1                     # 65

    key = jax.random.PRNGKey(0)
    k_emb, k_x = jax.random.split(key)

    emb_table = make_params(embed_dim, bit_size, radius_size, k_emb)
    x = jax.random.randint(k_x, (batch, seq_len), 0, vocab, dtype=jnp.int32)

    out = count_morgan_embedding(x, emb_table)
    out = jax.block_until_ready(out)

    # Pure-JAX reference (embedding lookup + mean over seq axis).
    ref = jnp.mean(emb_table[x], axis=1)
    assert out.shape == (batch, embed_dim)
    assert jnp.allclose(out, ref, atol=1e-5, rtol=1e-5)

    print("KERNEL_OK")
</pallas_src>

<mosaic_0001>
module attributes {stable_mosaic.version = 11 : i64} {
  func.func @_count_embed_kernel(%arg0: i32, %arg1: i32, %arg2: memref<64x8x1xi32, #tpu.memory_space<vmem>>, %arg3: memref<128x128xf32, #tpu.memory_space<vmem>>, %arg4: memref<8x128xf32, #tpu.memory_space<vmem>>, %arg5: memref<8x128xf32, #tpu.memory_space<vmem>>) attributes {dimension_semantics = [#tpu.dimension_semantics<parallel>, #tpu.dimension_semantics<arbitrary>], iteration_bounds = array<i64: 1, 1>, scalar_prefetch = 0 : i64, scratch_operands = 1 : i64, tpu.core_type = #tpu.core_type<tc>, window_params = [{transform_indices = @transform_0, window_bounds = array<i64: 64, 8, 1>}, {transform_indices = @transform_1, window_bounds = array<i64: 128, 128>}, {transform_indices = @transform_2, window_bounds = array<i64: 8, 128>}]} {
    %c0_i32 = arith.constant 0 : i32
    %0 = arith.cmpi eq, %arg1, %c0_i32 : i32
    %1 = arith.extui %0 : i1 to i32
    %c0_i32_0 = arith.constant 0 : i32
    %2 = arith.cmpi ne, %1, %c0_i32_0 : i32
    scf.if %2 {
      %cst_12 = arith.constant 0.000000e+00 : f32
      %21 = vector.broadcast %cst_12 : f32 to vector<8x128xf32>
      %c0_13 = arith.constant 0 : index
      %c0_14 = arith.constant 0 : index
      %22 = vector.load %arg5[%c0_13, %c0_14] : memref<8x128xf32, #tpu.memory_space<vmem>>, vector<8x128xf32>
      tpu.vector_store %arg5[%c0_13, %c0_14], %21 {strides = array<i32>} : memref<8x128xf32, #tpu.memory_space<vmem>>, vector<8x128xf32>,
    } else {
    }
    %c128_i32 = arith.constant 128 : i32
    %3 = arith.muli %arg1, %c128_i32 : i32
    %c0 = arith.constant 0 : index
    %c0_1 = arith.constant 0 : index
    %c0_2 = arith.constant 0 : index
    %4 = vector.load %arg2[%c0, %c0_1, %c0_2] : memref<64x8x1xi32, #tpu.memory_space<vmem>>, vector<64x8x1xi32>
    %5 = vector.broadcast %3 : i32 to vector<64x8x1xi32>
    %6 = arith.subi %4, %5 : vector<64x8x1xi32>
    %7 = tpu.iota {dimensions = array<i32: 2>} : vector<64x8x128xi32>
    %8 = vector.broadcast %6 : vector<64x8x1xi32> to vector<64x8x128xi32>
    %9 = arith.cmpi eq, %8, %7 : vector<64x8x128xi32>
    %10 = arith.extui %9 : vector<64x8x128xi1> to vector<64x8x128xi32>
    %11 = arith.sitofp %10 : vector<64x8x128xi32> to vector<64x8x128xf32>
    %cst = arith.constant dense<0.000000e+00> : vector<8x128xf32>
    %12 = vector.multi_reduction <add>, %11, %cst [0] : vector<64x8x128xf32> to vector<8x128xf32>
    %c0_3 = arith.constant 0 : index
    %c0_4 = arith.constant 0 : index
    %13 = vector.load %arg5[%c0_3, %c0_4] : memref<8x128xf32, #tpu.memory_space<vmem>>, vector<8x128xf32>
    %c0_5 = arith.constant 0 : index
    %c0_6 = arith.constant 0 : index
    %14 = vector.load %arg3[%c0_5, %c0_6] : memref<128x128xf32, #tpu.memory_space<vmem>>, vector<128x128xf32>
    %cst_7 = arith.constant dense<0.000000e+00> : vector<8x128xf32>
    %15 = tpu.matmul %12, %14, %cst_7 {dimension_numbers = #tpu.dot_dimension_numbers<[1], [0], [0], [1], [0, 0, 1, 1], [], []>} : vector<8x128xf32>, vector<128x128xf32>, vector<8x128xf32> -> vector<8x128xf32>
    %16 = arith.addf %13, %15 : vector<8x128xf32>
    %c0_8 = arith.constant 0 : index
    %c0_9 = arith.constant 0 : index
    %17 = vector.load %arg5[%c0_8, %c0_9] : memref<8x128xf32, #tpu.memory_space<vmem>>, vector<8x128xf32>
    tpu.vector_store %arg5[%c0_8, %c0_9], %16 {strides = array<i32>} : memref<8x128xf32, #tpu.memory_space<vmem>>, vector<8x128xf32>,
    %c0_i32_10 = arith.constant 0 : i32
    %18 = arith.cmpi eq, %arg1, %c0_i32_10 : i32
    %19 = arith.extui %18 : i1 to i32
    %c0_i32_11 = arith.constant 0 : i32
    %20 = arith.cmpi ne, %19, %c0_i32_11 : i32
    scf.if %20 {
      %c0_12 = arith.constant 0 : index
      %c0_13 = arith.constant 0 : index
      %21 = vector.load %arg5[%c0_12, %c0_13] : memref<8x128xf32, #tpu.memory_space<vmem>>, vector<8x128xf32>
      %cst_14 = arith.constant 1.562500e-02 : f32
      %22 = vector.broadcast %cst_14 : f32 to vector<8x128xf32>
      %23 = arith.mulf %21, %22 : vector<8x128xf32>
      %c0_15 = arith.constant 0 : index
      %c0_16 = arith.constant 0 : index
      %24 = vector.load %arg4[%c0_15, %c0_16] : memref<8x128xf32, #tpu.memory_space<vmem>>, vector<8x128xf32>
      tpu.vector_store %arg4[%c0_15, %c0_16], %23 {strides = array<i32>} : memref<8x128xf32, #tpu.memory_space<vmem>>, vector<8x128xf32>,
    } else {
    }
    return
  }
  func.func @transform_0(%arg0: i32, %arg1: i32) -> (i32, i32, i32) {
    %c0_i32 = arith.constant 0 : i32
    %c0_i32_0 = arith.constant 0 : i32
    %c0_i32_1 = arith.constant 0 : i32
    return %c0_i32, %arg0, %c0_i32_0 : i32, i32, i32
  }
  func.func @transform_1(%arg0: i32, %arg1: i32) -> (i32, i32) {
    %c0_i32 = arith.constant 0 : i32
    %c0_i32_0 = arith.constant 0 : i32
    return %arg1, %c0_i32 : i32, i32
  }
  func.func @transform_2(%arg0: i32, %arg1: i32) -> (i32, i32) {
    %c0_i32 = arith.constant 0 : i32
    %c0_i32_0 = arith.constant 0 : i32
    return %arg0, %c0_i32 : i32, i32
  }
}

</mosaic_0001>

<bundles_post_ra>
// kernel: tpu_custom_call.1
= control target key start
LH: loop header
LB: loop body
LE: loop exit
PB: predicated region body
PF: predicated region fallthrough
CT: control target
= control target key end

     0   :  { %v876_v2 = vmov 0   ;;  %s1279_s0 = inlined_call_operand.vmem [shape: s32[64,8,1], index: 0, kind: input, shape index: {}]   ;;  %s1280_s1 = inlined_call_operand.vmem [shape: f32[128,128], index: 1, kind: input, shape index: {}]   ;;  %s1281_s2 = inlined_call_operand.hbm [shape: f32[8,128], index: 2, kind: output, shape index: {}]  }
   0x1   :  { %v20_v0 = vld [vmem:[%s1279_s0 + $0x10] sm:$0xff]  ;;  %v18_v1 = vld [vmem:[%s1279_s0] sm:$0xff]  ;;  %851 = vset.pattern.permute.xlu1 %v876_v2  ;;  %850 = vset.pattern.permute.xlu0 %v876_v2  ;;  %v21_v3 = vld [vmem:[%s1279_s0 + $0x18] sm:$0xff] }
   0x2   :  { %156 = vperm.xlu1 %851, %v20_v0   ;;  %150 = vperm.xlu0 %850, %v18_v1   ;;  %v19_v4 = vld [vmem:[%s1279_s0 + $0x8] sm:$0xff]  ;;  %v22_v6 = vld [vmem:[%s1279_s0 + $0x20] sm:$0xff]  ;;  %v25_v7 = vld [vmem:[%s1279_s0 + $0x38] sm:$0xff] }
   0x3   :  { %v23_v5 = vld [vmem:[%s1279_s0 + $0x28] sm:$0xff]  ;;  %v24_v8 = vld [vmem:[%s1279_s0 + $0x30] sm:$0xff]  ;;  %v26_v10 = vld [vmem:[%s1279_s0 + $0x40] sm:$0xff] }
   0x4   :  { %v27_v9 = vld [vmem:[%s1279_s0 + $0x48] sm:$0xff]  ;;  %v29_v11 = vld [vmem:[%s1279_s0 + $0x58] sm:$0xff]  ;;  %v28_v12 = vld [vmem:[%s1279_s0 + $0x50] sm:$0xff] }
   0x6   :  { %159 = vperm.xlu1 %851, %v21_v3   ;;  %153 = vperm.xlu0 %850, %v19_v4  }
   0xa   :  { %165 = vperm.xlu1 %851, %v23_v5   ;;  %162 = vperm.xlu0 %850, %v22_v6  }
   0xe   :  { %171 = vperm.xlu1 %851, %v25_v7   ;;  %168 = vperm.xlu0 %850, %v24_v8  }
  0x12   :  { %177 = vperm.xlu1 %851, %v27_v9   ;;  %174 = vperm.xlu0 %850, %v26_v10  }
  0x13   :  { %7 = vsyncpa [#allocation4], 0  ;;  %v31_v13 = vld [vmem:[%s1279_s0 + $0x68] sm:$0xff]  ;;  %v30_v14 = vld [vmem:[%s1279_s0 + $0x60] sm:$0xff]  ;;  %v877_v58 = vmov 0.0|0.0   ;;  %vm878_vm0 = vmmov 0  }
  0x14   :  { %v33_v15 = vld [vmem:[%s1279_s0 + $0x78] sm:$0xff]  ;;  %v32_v16 = vld [vmem:[%s1279_s0 + $0x70] sm:$0xff]  ;;  %v35_v17 = vld [vmem:[%s1279_s0 + $0x88] sm:$0xff]  ;;  %821 = vmatprep.subr.bf16.mxu0 %v877_v58 }
  0x15   :  { %v34_v18 = vld [vmem:[%s1279_s0 + $0x80] sm:$0xff]  ;;  %v37_v19 = vld [vmem:[%s1279_s0 + $0x98] sm:$0xff]  ;;  %v36_v20 = vld [vmem:[%s1279_s0 + $0x90] sm:$0xff] }
  0x16   :  { %183 = vperm.xlu1 %851, %v29_v11   ;;  %180 = vperm.xlu0 %850, %v28_v12   ;;  %v39_v21 = vld [vmem:[%s1279_s0 + $0xa8] sm:$0xff]  ;;  %v38_v22 = vld [vmem:[%s1279_s0 + $0xa0] sm:$0xff]  ;;  %v41_v23 = vld [vmem:[%s1279_s0 + $0xb8] sm:$0xff] }
  0x17   :  { %v40_v24 = vld [vmem:[%s1279_s0 + $0xb0] sm:$0xff]  ;;  %v43_v25 = vld [vmem:[%s1279_s0 + $0xc8] sm:$0xff]  ;;  %v42_v26 = vld [vmem:[%s1279_s0 + $0xc0] sm:$0xff] }
  0x18   :  { %v45_v27 = vld [vmem:[%s1279_s0 + $0xd8] sm:$0xff]  ;;  %v44_v28 = vld [vmem:[%s1279_s0 + $0xd0] sm:$0xff]  ;;  %v47_v29 = vld [vmem:[%s1279_s0 + $0xe8] sm:$0xff] }
  0x19   :  { %v46_v30 = vld [vmem:[%s1279_s0 + $0xe0] sm:$0xff]  ;;  %v49_v31 = vld [vmem:[%s1279_s0 + $0xf8] sm:$0xff]  ;;  %v48_v32 = vld [vmem:[%s1279_s0 + $0xf0] sm:$0xff] }
  0x1a   :  { %189 = vperm.xlu1 %851, %v31_v13   ;;  %186 = vperm.xlu0 %850, %v30_v14   ;;  %v51_v33 = vld [vmem:[%s1279_s0 + $0x108] sm:$0xff]  ;;  %v50_v34 = vld [vmem:[%s1279_s0 + $0x100] sm:$0xff]  ;;  %v53_v35 = vld [vmem:[%s1279_s0 + $0x118] sm:$0xff] }
  0x1b   :  { %v52_v36 = vld [vmem:[%s1279_s0 + $0x110] sm:$0xff]  ;;  %v55_v37 = vld [vmem:[%s1279_s0 + $0x128] sm:$0xff]  ;;  %v54_v38 = vld [vmem:[%s1279_s0 + $0x120] sm:$0xff] }
  0x1c   :  { %v57_v39 = vld [vmem:[%s1279_s0 + $0x138] sm:$0xff]  ;;  %v56_v40 = vld [vmem:[%s1279_s0 + $0x130] sm:$0xff]  ;;  %v59_v41 = vld [vmem:[%s1279_s0 + $0x148] sm:$0xff] }
  0x1d   :  { %v58_v42 = vld [vmem:[%s1279_s0 + $0x140] sm:$0xff]  ;;  %v61_v43 = vld [vmem:[%s1279_s0 + $0x158] sm:$0xff]  ;;  %v60_v44 = vld [vmem:[%s1279_s0 + $0x150] sm:$0xff] }
  0x1e   :  { %195 = vperm.xlu1 %851, %v33_v15   ;;  %192 = vperm.xlu0 %850, %v32_v16   ;;  %v63_v45 = vld [vmem:[%s1279_s0 + $0x168] sm:$0xff]  ;;  %v62_v46 = vld [vmem:[%s1279_s0 + $0x160] sm:$0xff]  ;;  %v65_v47 = vld [vmem:[%s1279_s0 + $0x178] sm:$0xff] }
  0x1f   :  { %v64_v48 = vld [vmem:[%s1279_s0 + $0x170] sm:$0xff]  ;;  %v67_v49 = vld [vmem:[%s1279_s0 + $0x188] sm:$0xff]  ;;  %v66_v50 = vld [vmem:[%s1279_s0 + $0x180] sm:$0xff] }
  0x20   :  { %v69_v51 = vld [vmem:[%s1279_s0 + $0x198] sm:$0xff]  ;;  %v68_v52 = vld [vmem:[%s1279_s0 + $0x190] sm:$0xff]  ;;  %v597_v53 = vld [vmem:[%s1280_s1] sm:$0xff] }
  0x21   :  { %v598_v54 = vld [vmem:[%s1280_s1 + $0x8] sm:$0xff]  ;;  %v70_v57 = vld [vmem:[%s1279_s0 + $0x1a0] sm:$0xff]  ;;  %v599_v59 = vld [vmem:[%s1280_s1 + $0x10] sm:$0xff] }
  0x22   :  { %201 = vperm.xlu1 %851, %v35_v17   ;;  %198 = vperm.xlu0 %850, %v34_v18   ;;  %v822_v55 = vpack.c.bf16 %v598_v54, %v597_v53  ;;  %v71_v56 = vld [vmem:[%s1279_s0 + $0x1a8] sm:$0xff]  ;;  %v600_v60 = vld [vmem:[%s1280_s1 + $0x18] sm:$0xff]  ;;  %v72_v63 = vld [vmem:[%s1279_s0 + $0x1b0] sm:$0xff] }
  0x23   :  { %v825_v61 = vpack.c.bf16 %v600_v60, %v599_v59  ;;  %v73_v62 = vld [vmem:[%s1279_s0 + $0x1b8] sm:$0xff]  ;;  %v601_v0 = vld [vmem:[%s1280_s1 + $0x20] sm:$0xff]  ;;  %v602_v1 = vld [vmem:[%s1280_s1 + $0x28] sm:$0xff] }
  0x24   :  { %823 = vmatpush3.bf16.msra.mxu0 %v822_v55  ;;  %v828_v2 = vpack.c.bf16 %v602_v1, %v601_v0  ;;  %v75_v3 = vld [vmem:[%s1279_s0 + $0x1c8] sm:$0xff]  ;;  %v74_v4 = vld [vmem:[%s1279_s0 + $0x1c0] sm:$0xff]  ;;  %v603_v5 = vld [vmem:[%s1280_s1 + $0x30] sm:$0xff] }
  0x25   :  { %824 = vmatprep.subr.bf16.mxu0 %v877_v58  ;;  %v604_v6 = vld [vmem:[%s1280_s1 + $0x38] sm:$0xff]  ;;  %v76_v9 = vld [vmem:[%s1279_s0 + $0x1d0] sm:$0xff]  ;;  %v605_v10 = vld [vmem:[%s1280_s1 + $0x40] sm:$0xff] }
  0x26   :  { %207 = vperm.xlu1 %851, %v37_v19   ;;  %204 = vperm.xlu0 %850, %v36_v20   ;;  %v831_v7 = vpack.c.bf16 %v604_v6, %v603_v5  ;;  %v77_v8 = vld [vmem:[%s1279_s0 + $0x1d8] sm:$0xff]  ;;  %v606_v11 = vld [vmem:[%s1280_s1 + $0x48] sm:$0xff]  ;;  %v78_v14 = vld [vmem:[%s1279_s0 + $0x1e0] sm:$0xff]  ;;  %v147_v20 = vlaneseq }
  0x27   :  { %v834_v12 = vpack.c.bf16 %v606_v11, %v605_v10  ;;  %v79_v13 = vld [vmem:[%s1279_s0 + $0x1e8] sm:$0xff]  ;;  %v607_v15 = vld [vmem:[%s1280_s1 + $0x50] sm:$0xff]  ;;  %v608_v16 = vld [vmem:[%s1280_s1 + $0x58] sm:$0xff] }
  0x28   :  { %826 = vmatpush3.bf16.msra.mxu0 %v825_v61  ;;  %v837_v17 = vpack.c.bf16 %v608_v16, %v607_v15  ;;  %v81_v18 = vld [vmem:[%s1279_s0 + $0x1f8] sm:$0xff]  ;;  %v80_v19 = vld [vmem:[%s1279_s0 + $0x1f0] sm:$0xff] }
  0x29   :  { %827 = vmatprep.subr.bf16.mxu0 %v877_v58 }
  0x2a   :  { %213 = vperm.xlu1 %851, %v39_v21   ;;  %210 = vperm.xlu0 %850, %v38_v22   ;;  %v609_v21 = vld [vmem:[%s1280_s1 + $0x60] sm:$0xff]  ;;  %v610_v22 = vld [vmem:[%s1280_s1 + $0x68] sm:$0xff] }
  0x2c   :  { %829 = vmatpush3.bf16.msra.mxu0 %v828_v2 }
  0x2d   :  { %830 = vmatprep.subr.bf16.mxu0 %v877_v58 }
  0x2e   :  { %219 = vperm.xlu1 %851, %v41_v23   ;;  %216 = vperm.xlu0 %850, %v40_v24   ;;  %v840_v23 = vpack.c.bf16 %v610_v22, %v609_v21  ;;  %v1130_v24 = vand.u32 127, %v147_v20 }
  0x30   :  { %832 = vmatpush3.bf16.msra.mxu0 %v831_v7 }
  0x31   :  { %833 = vmatprep.subr.bf16.mxu0 %v877_v58 }
  0x32   :  { %225 = vperm.xlu1 %851, %v43_v25   ;;  %222 = vperm.xlu0 %850, %v42_v26   ;;  %v611_v25 = vld [vmem:[%s1280_s1 + $0x70] sm:$0xff]  ;;  %v612_v26 = vld [vmem:[%s1280_s1 + $0x78] sm:$0xff]  ;;  %s880_s1 = smov [#allocation3]  }
  0x33   :  { %s697_s28 = sshll.u32 %s880_s1, 4  ;;  %s698_s28 = int_to_ptr.vmem [resolvable:$true] %s697_s28 }
  0x34   :  { %835 = vmatpush3.bf16.msra.mxu0 %v834_v12  ;;  %s852_s29 = scalar_lea.vmem %s698_s28, 128  ;;  %p857_p1 = scmp.lt.s32.totalorder %s698_s28, %s698_s28 }
  0x35   :  { %836 = vmatprep.subr.bf16.mxu0 %v877_v58  ;;  %p853_p0 = scmp.ne.s32.totalorder %s698_s28, %s852_s29  ;;  %p858_p2 = scmp.lt.s32.totalorder %s852_s29, %s852_s29 }
  0x36   :  { %231 = vperm.xlu1 %851, %v45_v27   ;;  %228 = vperm.xlu0 %850, %v44_v28  }
  0x37   :  { %p859_p3 = por %p858_p2, %p857_p1 }
  0x38   :  { %838 = vmatpush3.bf16.msra.mxu0 %v837_v17 }
  0x39   :  { %839 = vmatprep.subr.bf16.mxu0 %v877_v58  ;;  %p860_p4 = pnand %p859_p3, %p853_p0 }
  0x3a   :  { %237 = vperm.xlu1 %851, %v47_v29   ;;  %234 = vperm.xlu0 %850, %v46_v30   ;;  %v843_v29 = vpack.c.bf16 %v612_v26, %v611_v25  ;;  %v879_v30 = vmov 0.0  }
  0x3b   :  { %818 = vmatprep.mubr.msk.f32.mxu0 %vm878_vm0, %v879_v30 }
  0x3c   :  { %841 = vmatpush3.bf16.msra.mxu0 %v840_v23 }
  0x3d   :  { %842 = vmatprep.subr.bf16.mxu0 %v877_v58 }
  0x3e   :  { %243 = vperm.xlu1 %851, %v49_v31   ;;  %240 = vperm.xlu0 %850, %v48_v32  }
  0x40   :  { %844 = vmatpush3.bf16.msra.mxu0 %v843_v29 }
  0x42   :  { %249 = vperm.xlu1 %851, %v51_v33   ;;  %246 = vperm.xlu0 %850, %v50_v34  }
  0x46   :  { %255 = vperm.xlu1 %851, %v53_v35   ;;  %252 = vperm.xlu0 %850, %v52_v36  }
  0x4a   :  { %261 = vperm.xlu1 %851, %v55_v37   ;;  %258 = vperm.xlu0 %850, %v54_v38  }
  0x4e   :  { %267 = vperm.xlu1 %851, %v57_v39   ;;  %264 = vperm.xlu0 %850, %v56_v40  }
  0x52   :  { %273 = vperm.xlu1 %851, %v59_v41   ;;  %270 = vperm.xlu0 %850, %v58_v42  }
  0x56   :  { %279 = vperm.xlu1 %851, %v61_v43   ;;  %276 = vperm.xlu0 %850, %v60_v44  }
  0x5a   :  { %285 = vperm.xlu1 %851, %v63_v45   ;;  %282 = vperm.xlu0 %850, %v62_v46  }
  0x5e   :  { %291 = vperm.xlu1 %851, %v65_v47   ;;  %288 = vperm.xlu0 %850, %v64_v48  }
  0x62   :  { %297 = vperm.xlu1 %851, %v67_v49   ;;  %294 = vperm.xlu0 %850, %v66_v50  }
  0x66   :  { %303 = vperm.xlu1 %851, %v69_v51   ;;  %300 = vperm.xlu0 %850, %v68_v52  }
  0x6a   :  { %309 = vperm.xlu1 %851, %v71_v56   ;;  %306 = vperm.xlu0 %850, %v70_v57  }
  0x6e   :  { %315 = vperm.xlu1 %851, %v73_v62   ;;  %312 = vperm.xlu0 %850, %v72_v63  }
  0x72   :  { %321 = vperm.xlu1 %851, %v75_v3   ;;  %318 = vperm.xlu0 %850, %v74_v4  }
  0x76   :  { %327 = vperm.xlu1 %851, %v77_v8   ;;  %324 = vperm.xlu0 %850, %v76_v9  }
  0x7a   :  { %333 = vperm.xlu1 %851, %v79_v13   ;;  %330 = vperm.xlu0 %850, %v78_v14  }
  0x7e   :  { %339 = vperm.xlu1 %851, %v81_v18   ;;  %336 = vperm.xlu0 %850, %v80_v19  }
  0x81   :  { %v157_v27 = vpop.permute.xlu1 %156  ;;  %v151_v28 = vpop.permute.xlu0 %150 }
  0x82   :  { %vm341_vm1 = vcmp.eq.s32.totalorder %v151_v28, %v1130_v24  ;;  %vm343_vm2 = vcmp.eq.s32.totalorder %v157_v27, %v1130_v24 }
  0x83   :  { %v705_v33 = vsel %vm341_vm1, 1.0, %v879_v30  ;;  %v707_v36 = vsel %vm343_vm2, 1.0, %v879_v30 }
  0x85   :  { %v160_v31 = vpop.permute.xlu1 %159  ;;  %v154_v32 = vpop.permute.xlu0 %153 }
  0x86   :  { %vm342_vm3 = vcmp.eq.s32.totalorder %v154_v32, %v1130_v24  ;;  %vm344_vm4 = vcmp.eq.s32.totalorder %v160_v31, %v1130_v24 }
  0x87   :  { %v706_v34 = vsel %vm342_vm3, 1.0, %v879_v30  ;;  %v708_v40 = vsel %vm344_vm4, 1.0, %v879_v30 }
  0x88   :  { %v533_v35 = vadd.f32 %v706_v34, %v705_v33 }
  0x89   :  { %v166_v37 = vpop.permute.xlu1 %165  ;;  %v163_v38 = vpop.permute.xlu0 %162 }
  0x8a   :  { %v534_v39 = vadd.f32 %v707_v36, %v533_v35  ;;  %vm345_vm5 = vcmp.eq.s32.totalorder %v163_v38, %v1130_v24  ;;  %vm346_vm6 = vcmp.eq.s32.totalorder %v166_v37, %v1130_v24 }
  0x8b   :  { %v709_v42 = vsel %vm345_vm5, 1.0, %v879_v30  ;;  %v710_v46 = vsel %vm346_vm6, 1.0, %v879_v30 }
  0x8c   :  { %v535_v41 = vadd.f32 %v708_v40, %v534_v39 }
  0x8d   :  { %v172_v43 = vpop.permute.xlu1 %171  ;;  %v169_v44 = vpop.permute.xlu0 %168 }
  0x8e   :  { %v536_v45 = vadd.f32 %v709_v42, %v535_v41  ;;  %vm347_vm7 = vcmp.eq.s32.totalorder %v169_v44, %v1130_v24  ;;  %vm348_vm8 = vcmp.eq.s32.totalorder %v172_v43, %v1130_v24 }
  0x8f   :  { %v711_v48 = vsel %vm347_vm7, 1.0, %v879_v30  ;;  %v712_v52 = vsel %vm348_vm8, 1.0, %v879_v30 }
  0x90   :  { %v537_v47 = vadd.f32 %v710_v46, %v536_v45 }
  0x91   :  { %v178_v49 = vpop.permute.xlu1 %177  ;;  %v175_v50 = vpop.permute.xlu0 %174 }
  0x92   :  { %v538_v51 = vadd.f32 %v711_v48, %v537_v47  ;;  %vm349_vm9 = vcmp.eq.s32.totalorder %v175_v50, %v1130_v24  ;;  %vm350_vm10 = vcmp.eq.s32.totalorder %v178_v49, %v1130_v24 }
  0x93   :  { %v713_v54 = vsel %vm349_vm9, 1.0, %v879_v30  ;;  %v714_v58 = vsel %vm350_vm10, 1.0, %v879_v30 }
  0x94   :  { %v539_v53 = vadd.f32 %v712_v52, %v538_v51 }
  0x95   :  { %v184_v55 = vpop.permute.xlu1 %183  ;;  %v181_v56 = vpop.permute.xlu0 %180 }
  0x96   :  { %v540_v57 = vadd.f32 %v713_v54, %v539_v53  ;;  %vm351_vm11 = vcmp.eq.s32.totalorder %v181_v56, %v1130_v24  ;;  %vm352_vm12 = vcmp.eq.s32.totalorder %v184_v55, %v1130_v24 }
  0x97   :  { %v715_v60 = vsel %vm351_vm11, 1.0, %v879_v30  ;;  %v716_v0 = vsel %vm352_vm12, 1.0, %v879_v30 }
  0x98   :  { %v541_v59 = vadd.f32 %v714_v58, %v540_v57 }
  0x99   :  { %v190_v61 = vpop.permute.xlu1 %189  ;;  %v187_v62 = vpop.permute.xlu0 %186 }
  0x9a   :  { %v542_v63 = vadd.f32 %v715_v60, %v541_v59  ;;  %vm353_vm13 = vcmp.eq.s32.totalorder %v187_v62, %v1130_v24  ;;  %vm354_vm14 = vcmp.eq.s32.totalorder %v190_v61, %v1130_v24 }
  0x9b   :  { %v717_v2 = vsel %vm353_vm13, 1.0, %v879_v30  ;;  %v718_v6 = vsel %vm354_vm14, 1.0, %v879_v30 }
  0x9c   :  { %v543_v1 = vadd.f32 %v716_v0, %v542_v63 }
  0x9d   :  { %v196_v3 = vpop.permute.xlu1 %195  ;;  %v193_v4 = vpop.permute.xlu0 %192 }
  0x9e   :  { %v544_v5 = vadd.f32 %v717_v2, %v543_v1  ;;  %vm355_vm15 = vcmp.eq.s32.totalorder %v193_v4, %v1130_v24  ;;  %vm356_vm0 = vcmp.eq.s32.totalorder %v196_v3, %v1130_v24 }
  0x9f   :  { %v719_v8 = vsel %vm355_vm15, 1.0, %v879_v30  ;;  %v720_v12 = vsel %vm356_vm0, 1.0, %v879_v30 }
  0xa0   :  { %v545_v7 = vadd.f32 %v718_v6, %v544_v5 }
  0xa1   :  { %v202_v9 = vpop.permute.xlu1 %201  ;;  %v199_v10 = vpop.permute.xlu0 %198 }
  0xa2   :  { %v546_v11 = vadd.f32 %v719_v8, %v545_v7  ;;  %vm357_vm1 = vcmp.eq.s32.totalorder %v199_v10, %v1130_v24  ;;  %vm358_vm2 = vcmp.eq.s32.totalorder %v202_v9, %v1130_v24 }
  0xa3   :  { %v721_v14 = vsel %vm357_vm1, 1.0, %v879_v30  ;;  %v722_v18 = vsel %vm358_vm2, 1.0, %v879_v30 }
  0xa4   :  { %v547_v13 = vadd.f32 %v720_v12, %v546_v11 }
  0xa5   :  { %v208_v15 = vpop.permute.xlu1 %207  ;;  %v205_v16 = vpop.permute.xlu0 %204 }
  0xa6   :  { %v548_v17 = vadd.f32 %v721_v14, %v547_v13  ;;  %vm359_vm3 = vcmp.eq.s32.totalorder %v205_v16, %v1130_v24  ;;  %vm360_vm4 = vcmp.eq.s32.totalorder %v208_v15, %v1130_v24 }
  0xa7   :  { %v723_v20 = vsel %vm359_vm3, 1.0, %v879_v30  ;;  %v724_v25 = vsel %vm360_vm4, 1.0, %v879_v30 }
  0xa8   :  { %v549_v19 = vadd.f32 %v722_v18, %v548_v17 }
  0xa9   :  { %v214_v21 = vpop.permute.xlu1 %213  ;;  %v211_v22 = vpop.permute.xlu0 %210 }
  0xaa   :  { %v550_v23 = vadd.f32 %v723_v20, %v549_v19  ;;  %vm361_vm5 = vcmp.eq.s32.totalorder %v211_v22, %v1130_v24  ;;  %vm362_vm6 = vcmp.eq.s32.totalorder %v214_v21, %v1130_v24 }
  0xab   :  { %v725_v27 = vsel %vm361_vm5, 1.0, %v879_v30  ;;  %v726_v32 = vsel %vm362_vm6, 1.0, %v879_v30 }
  0xac   :  { %v551_v26 = vadd.f32 %v724_v25, %v550_v23 }
  0xad   :  { %v220_v28 = vpop.permute.xlu1 %219  ;;  %v217_v29 = vpop.permute.xlu0 %216 }
  0xae   :  { %v552_v31 = vadd.f32 %v725_v27, %v551_v26  ;;  %vm363_vm7 = vcmp.eq.s32.totalorder %v217_v29, %v1130_v24  ;;  %vm364_vm8 = vcmp.eq.s32.totalorder %v220_v28, %v1130_v24 }
  0xaf   :  { %v727_v34 = vsel %vm363_vm7, 1.0, %v879_v30  ;;  %v728_v38 = vsel %vm364_vm8, 1.0, %v879_v30 }
  0xb0   :  { %v553_v33 = vadd.f32 %v726_v32, %v552_v31 }
  0xb1   :  { %v226_v35 = vpop.permute.xlu1 %225  ;;  %v223_v36 = vpop.permute.xlu0 %222 }
  0xb2   :  { %v554_v37 = vadd.f32 %v727_v34, %v553_v33  ;;  %vm365_vm9 = vcmp.eq.s32.totalorder %v223_v36, %v1130_v24  ;;  %vm366_vm10 = vcmp.eq.s32.totalorder %v226_v35, %v1130_v24 }
  0xb3   :  { %v729_v40 = vsel %vm365_vm9, 1.0, %v879_v30  ;;  %v730_v44 = vsel %vm366_vm10, 1.0, %v879_v30 }
  0xb4   :  { %v555_v39 = vadd.f32 %v728_v38, %v554_v37 }
  0xb5   :  { %v232_v41 = vpop.permute.xlu1 %231  ;;  %v229_v42 = vpop.permute.xlu0 %228 }
  0xb6   :  { %v556_v43 = vadd.f32 %v729_v40, %v555_v39  ;;  %vm367_vm11 = vcmp.eq.s32.totalorder %v229_v42, %v1130_v24  ;;  %vm368_vm12 = vcmp.eq.s32.totalorder %v232_v41, %v1130_v24 }
  0xb7   :  { %v731_v46 = vsel %vm367_vm11, 1.0, %v879_v30  ;;  %v732_v50 = vsel %vm368_vm12, 1.0, %v879_v30 }
  0xb8   :  { %v557_v45 = vadd.f32 %v730_v44, %v556_v43 }
  0xb9   :  { %v238_v47 = vpop.permute.xlu1 %237  ;;  %v235_v48 = vpop.permute.xlu0 %234 }
  0xba   :  { %v558_v49 = vadd.f32 %v731_v46, %v557_v45  ;;  %vm369_vm13 = vcmp.eq.s32.totalorder %v235_v48, %v1130_v24  ;;  %vm370_vm14 = vcmp.eq.s32.totalorder %v238_v47, %v1130_v24 }
  0xbb   :  { %v733_v52 = vsel %vm369_vm13, 1.0, %v879_v30  ;;  %v734_v56 = vsel %vm370_vm14, 1.0, %v879_v30 }
  0xbc   :  { %v559_v51 = vadd.f32 %v732_v50, %v558_v49 }
  0xbd   :  { %v244_v53 = vpop.permute.xlu1 %243  ;;  %v241_v54 = vpop.permute.xlu0 %240 }
  0xbe   :  { %v560_v55 = vadd.f32 %v733_v52, %v559_v51  ;;  %vm371_vm15 = vcmp.eq.s32.totalorder %v241_v54, %v1130_v24  ;;  %vm372_vm0 = vcmp.eq.s32.totalorder %v244_v53, %v1130_v24 }
  0xbf   :  { %v735_v58 = vsel %vm371_vm15, 1.0, %v879_v30  ;;  %v736_v62 = vsel %vm372_vm0, 1.0, %v879_v30 }
  0xc0   :  { %v561_v57 = vadd.f32 %v734_v56, %v560_v55 }
  0xc1   :  { %v250_v59 = vpop.permute.xlu1 %249  ;;  %v247_v60 = vpop.permute.xlu0 %246 }
  0xc2   :  { %v562_v61 = vadd.f32 %v735_v58, %v561_v57  ;;  %vm373_vm1 = vcmp.eq.s32.totalorder %v247_v60, %v1130_v24  ;;  %vm374_vm2 = vcmp.eq.s32.totalorder %v250_v59, %v1130_v24 }
  0xc3   :  { %v737_v0 = vsel %vm373_vm1, 1.0, %v879_v30  ;;  %v738_v4 = vsel %vm374_vm2, 1.0, %v879_v30 }
  0xc4   :  { %v563_v63 = vadd.f32 %v736_v62, %v562_v61 }
  0xc5   :  { %v256_v1 = vpop.permute.xlu1 %255  ;;  %v253_v2 = vpop.permute.xlu0 %252 }
  0xc6   :  { %v564_v3 = vadd.f32 %v737_v0, %v563_v63  ;;  %vm375_vm3 = vcmp.eq.s32.totalorder %v253_v2, %v1130_v24  ;;  %vm376_vm4 = vcmp.eq.s32.totalorder %v256_v1, %v1130_v24 }
  0xc7   :  { %v739_v6 = vsel %vm375_vm3, 1.0, %v879_v30  ;;  %v740_v10 = vsel %vm376_vm4, 1.0, %v879_v30 }
  0xc8   :  { %v565_v5 = vadd.f32 %v738_v4, %v564_v3 }
  0xc9   :  { %v262_v7 = vpop.permute.xlu1 %261  ;;  %v259_v8 = vpop.permute.xlu0 %258 }
  0xca   :  { %v566_v9 = vadd.f32 %v739_v6, %v565_v5  ;;  %vm377_vm5 = vcmp.eq.s32.totalorder %v259_v8, %v1130_v24  ;;  %vm378_vm6 = vcmp.eq.s32.totalorder %v262_v7, %v1130_v24 }
  0xcb   :  { %v741_v12 = vsel %vm377_vm5, 1.0, %v879_v30  ;;  %v742_v16 = vsel %vm378_vm6, 1.0, %v879_v30 }
  0xcc   :  { %v567_v11 = vadd.f32 %v740_v10, %v566_v9 }
  0xcd   :  { %v268_v13 = vpop.permute.xlu1 %267  ;;  %v265_v14 = vpop.permute.xlu0 %264 }
  0xce   :  { %v568_v15 = vadd.f32 %v741_v12, %v567_v11  ;;  %vm379_vm7 = vcmp.eq.s32.totalorder %v265_v14, %v1130_v24  ;;  %vm380_vm8 = vcmp.eq.s32.totalorder %v268_v13, %v1130_v24 }
  0xcf   :  { %v743_v18 = vsel %vm379_vm7, 1.0, %v879_v30  ;;  %v744_v22 = vsel %vm380_vm8, 1.0, %v879_v30 }
  0xd0   :  { %v569_v17 = vadd.f32 %v742_v16, %v568_v15 }
  0xd1   :  { %v274_v19 = vpop.permute.xlu1 %273  ;;  %v271_v20 = vpop.permute.xlu0 %270 }
  0xd2   :  { %v570_v21 = vadd.f32 %v743_v18, %v569_v17  ;;  %vm381_vm9 = vcmp.eq.s32.totalorder %v271_v20, %v1130_v24  ;;  %vm382_vm10 = vcmp.eq.s32.totalorder %v274_v19, %v1130_v24 }
  0xd3   :  { %v745_v25 = vsel %vm381_vm9, 1.0, %v879_v30  ;;  %v746_v29 = vsel %vm382_vm10, 1.0, %v879_v30 }
  0xd4   :  { %v571_v23 = vadd.f32 %v744_v22, %v570_v21 }
  0xd5   :  { %v280_v26 = vpop.permute.xlu1 %279  ;;  %v277_v27 = vpop.permute.xlu0 %276 }
  0xd6   :  { %v572_v28 = vadd.f32 %v745_v25, %v571_v23  ;;  %vm383_vm11 = vcmp.eq.s32.totalorder %v277_v27, %v1130_v24  ;;  %vm384_vm12 = vcmp.eq.s32.totalorder %v280_v26, %v1130_v24 }
  0xd7   :  { %v747_v32 = vsel %vm383_vm11, 1.0, %v879_v30  ;;  %v748_v36 = vsel %vm384_vm12, 1.0, %v879_v30 }
  0xd8   :  { %v573_v31 = vadd.f32 %v746_v29, %v572_v28 }
  0xd9   :  { %v286_v33 = vpop.permute.xlu1 %285  ;;  %v283_v34 = vpop.permute.xlu0 %282 }
  0xda   :  { %v574_v35 = vadd.f32 %v747_v32, %v573_v31  ;;  %vm385_vm13 = vcmp.eq.s32.totalorder %v283_v34, %v1130_v24  ;;  %vm386_vm14 = vcmp.eq.s32.totalorder %v286_v33, %v1130_v24 }
  0xdb   :  { %v749_v38 = vsel %vm385_vm13, 1.0, %v879_v30  ;;  %v750_v42 = vsel %vm386_vm14, 1.0, %v879_v30 }
  0xdc   :  { %v575_v37 = vadd.f32 %v748_v36, %v574_v35 }
  0xdd   :  { %v292_v39 = vpop.permute.xlu1 %291  ;;  %v289_v40 = vpop.permute.xlu0 %288 }
  0xde   :  { %v576_v41 = vadd.f32 %v749_v38, %v575_v37  ;;  %vm387_vm15 = vcmp.eq.s32.totalorder %v289_v40, %v1130_v24  ;;  %vm388_vm0 = vcmp.eq.s32.totalorder %v292_v39, %v1130_v24 }
  0xdf   :  { %v751_v44 = vsel %vm387_vm15, 1.0, %v879_v30  ;;  %v752_v48 = vsel %vm388_vm0, 1.0, %v879_v30 }
  0xe0   :  { %v577_v43 = vadd.f32 %v750_v42, %v576_v41 }
  0xe1   :  { %v298_v45 = vpop.permute.xlu1 %297  ;;  %v295_v46 = vpop.permute.xlu0 %294 }
  0xe2   :  { %v578_v47 = vadd.f32 %v751_v44, %v577_v43  ;;  %vm389_vm1 = vcmp.eq.s32.totalorder %v295_v46, %v1130_v24  ;;  %vm390_vm2 = vcmp.eq.s32.totalorder %v298_v45, %v1130_v24 }
  0xe3   :  { %v753_v50 = vsel %vm389_vm1, 1.0, %v879_v30  ;;  %v754_v54 = vsel %vm390_vm2, 1.0, %v879_v30 }
  0xe4   :  { %v579_v49 = vadd.f32 %v752_v48, %v578_v47 }
  0xe5   :  { %v304_v51 = vpop.permute.xlu1 %303  ;;  %v301_v52 = vpop.permute.xlu0 %300 }
  0xe6   :  { %v580_v53 = vadd.f32 %v753_v50, %v579_v49  ;;  %vm391_vm3 = vcmp.eq.s32.totalorder %v301_v52, %v1130_v24  ;;  %vm392_vm4 = vcmp.eq.s32.totalorder %v304_v51, %v1130_v24 }
  0xe7   :  { %v755_v56 = vsel %vm391_vm3, 1.0, %v879_v30  ;;  %v756_v60 = vsel %vm392_vm4, 1.0, %v879_v30 }
  0xe8   :  { %v581_v55 = vadd.f32 %v754_v54, %v580_v53 }
  0xe9   :  { %v310_v57 = vpop.permute.xlu1 %309  ;;  %v307_v58 = vpop.permute.xlu0 %306 }
  0xea   :  { %v582_v59 = vadd.f32 %v755_v56, %v581_v55  ;;  %vm393_vm5 = vcmp.eq.s32.totalorder %v307_v58, %v1130_v24  ;;  %vm394_vm6 = vcmp.eq.s32.totalorder %v310_v57, %v1130_v24 }
  0xeb   :  { %v757_v62 = vsel %vm393_vm5, 1.0, %v879_v30  ;;  %v758_v2 = vsel %vm394_vm6, 1.0, %v879_v30 }
  0xec   :  { %v583_v61 = vadd.f32 %v756_v60, %v582_v59 }
  0xed   :  { %v316_v63 = vpop.permute.xlu1 %315  ;;  %v313_v0 = vpop.permute.xlu0 %312 }
  0xee   :  { %v584_v1 = vadd.f32 %v757_v62, %v583_v61  ;;  %vm395_vm7 = vcmp.eq.s32.totalorder %v313_v0, %v1130_v24  ;;  %vm396_vm8 = vcmp.eq.s32.totalorder %v316_v63, %v1130_v24 }
  0xef   :  { %v759_v4 = vsel %vm395_vm7, 1.0, %v879_v30  ;;  %v760_v8 = vsel %vm396_vm8, 1.0, %v879_v30 }
  0xf0   :  { %v585_v3 = vadd.f32 %v758_v2, %v584_v1 }
  0xf1   :  { %v322_v5 = vpop.permute.xlu1 %321  ;;  %v319_v6 = vpop.permute.xlu0 %318 }
  0xf2   :  { %v586_v7 = vadd.f32 %v759_v4, %v585_v3  ;;  %vm397_vm9 = vcmp.eq.s32.totalorder %v319_v6, %v1130_v24  ;;  %vm398_vm10 = vcmp.eq.s32.totalorder %v322_v5, %v1130_v24 }
  0xf3   :  { %v761_v10 = vsel %vm397_vm9, 1.0, %v879_v30  ;;  %v762_v14 = vsel %vm398_vm10, 1.0, %v879_v30 }
  0xf4   :  { %v587_v9 = vadd.f32 %v760_v8, %v586_v7 }
  0xf5   :  { %v328_v11 = vpop.permute.xlu1 %327  ;;  %v325_v12 = vpop.permute.xlu0 %324 }
  0xf6   :  { %v588_v13 = vadd.f32 %v761_v10, %v587_v9  ;;  %vm399_vm11 = vcmp.eq.s32.totalorder %v325_v12, %v1130_v24  ;;  %vm400_vm12 = vcmp.eq.s32.totalorder %v328_v11, %v1130_v24 }
  0xf7   :  { %v763_v16 = vsel %vm399_vm11, 1.0, %v879_v30  ;;  %v764_v20 = vsel %vm400_vm12, 1.0, %v879_v30 }
  0xf8   :  { %v589_v15 = vadd.f32 %v762_v14, %v588_v13 }
  0xf9   :  { %v334_v17 = vpop.permute.xlu1 %333  ;;  %v331_v18 = vpop.permute.xlu0 %330 }
  0xfa   :  { %v590_v19 = vadd.f32 %v763_v16, %v589_v15  ;;  %vm401_vm13 = vcmp.eq.s32.totalorder %v331_v18, %v1130_v24  ;;  %vm402_vm14 = vcmp.eq.s32.totalorder %v334_v17, %v1130_v24 }
  0xfb   :  { %v765_v22 = vsel %vm401_vm13, 1.0, %v879_v30  ;;  %v766_v27 = vsel %vm402_vm14, 1.0, %v879_v30 }
  0xfc   :  { %v591_v21 = vadd.f32 %v764_v20, %v590_v19 }
  0xfd   :  { %v340_v23 = vpop.permute.xlu1 %339  ;;  %v337_v25 = vpop.permute.xlu0 %336 }
  0xfe   :  { %v592_v26 = vadd.f32 %v765_v22, %v591_v21  ;;  %vm403_vm15 = vcmp.eq.s32.totalorder %v337_v25, %v1130_v24  ;;  %vm404_vm0 = vcmp.eq.s32.totalorder %v340_v23, %v1130_v24 }
  0xff   :  { %v767_v29 = vsel %vm403_vm15, 1.0, %v879_v30  ;;  %v768_v32 = vsel %vm404_vm0, 1.0, %v879_v30 }
 0x100   :  { %v593_v28 = vadd.f32 %v766_v27, %v592_v26 }
 0x102   :  { %v594_v31 = vadd.f32 %v767_v29, %v593_v28 }
 0x104   :  { %v595_v33 = vadd.f32 %v768_v32, %v594_v31 }
 0x106   :  { %819 = vmatmul.mubr.f32.vlgmr.msra.gmra.mrb[0].mxu0 %v595_v33 }
 0x1d9   :  { %v679_v34 = vpop.f32.mrb[0].mxu0 }
 0x1da   :  { %v689_v35 = vmul.f32 0.015625, %v679_v34  ;;  %v820_v36 = vpop.f32.mrb[1].mxu0 }
 0x1dc   :  { %690 = vst [vmem:[#allocation3] sm:$0xff] %v689_v35 }
 0x1dd   :  { %863 = shalt.err (!%p860_p4)
}
 0x1de   :  { %s864_s4 = scalar_lea.hbm %s1281_s2, 128 }
 0x1df   :  { %p865_p5 = scmp.ne.s32.totalorder %s1281_s2, %s864_s4  ;;  %p868_p6 = scmp.lt.u32.totalorder %s864_s4, %s1281_s2 }
 0x1e1   :  { %p870_p7 = pnand %p868_p6, %p865_p5 }
 0x1e3   :  { %873 = shalt.err (!%p870_p7)
}
 0x1e4   :  { %700 = dma.vmem_to_hbm [thread:$0]  %s698_s28, 128, %s1281_s2, [#allocation4]  }
 0x1e5   :  { %874 = dma.done.wait [#allocation4], 128  }
 0x1e6   :  { %875 = vsyncadd [#allocation4], 4294967168 }
 0x1e7   :  { %704 = vsyncpa [#allocation4], 1 }

</bundles_post_ra>
